<compile_context>
chip_gen: v5e
topology: v5e:2x2
jax: 0.10.0
libtpu: 0.0.40
codegen_flags: <defaults>
</compile_context>

<pallas_src>
import functools

import jax
import jax.numpy as jnp
import numpy as np
from jax.experimental import pallas as pl
from jax.experimental.pallas import tpu as pltpu


def _convlstm_gate_kernel(patch_ref, w_ref, b_ref, c_ref, newh_ref, newc_ref,
                          *, C):
    """One tile of M = N*H*W flattened output positions per grid step.

    patch_ref : (K*K*Cin, tm) bf16  im2col columns for this tile       [VMEM]
    w_ref     : (4C, K*K*Cin) bf16  conv weight (OIHW flattened)       [VMEM]
    b_ref     : (4C, 1)       f32   conv bias (forget_bias folded in)  [VMEM]
    c_ref     : (C, tm)       f32   previous cell state                [VMEM]
    newh_ref, newc_ref : (C, tm) f32 outputs                           [VMEM]
    """
    # Convolution for this tile: a single MXU matmul, f32 accumulation.
    # Lane axis = tm (spatial positions), sublane axis = output channels.
    acc = jnp.dot(w_ref[...], patch_ref[...],
                  preferred_element_type=jnp.float32)          # (4C, tm)
    acc = acc + b_ref[...]                                     # (4C,1) bcast

    # LSTM gates. Channel order along sublanes: [i | j | f | o].
    # One wide sigmoid slab over all rows (EUP), tanh only on the j rows.
    sig = jax.nn.sigmoid(acc)
    i_s = sig[0 * C:1 * C, :]
    f_s = sig[2 * C:3 * C, :]          # forget_bias already folded into bias
    o_s = sig[3 * C:4 * C, :]
    j_t = jnp.tanh(acc[1 * C:2 * C, :])

    c_prev = c_ref[...]
    new_c = c_prev * f_s + i_s * j_t
    new_h = jnp.tanh(new_c) * o_s

    newc_ref[...] = new_c
    newh_ref[...] = new_h


def _pick_m_tile(M, cap=2048):
    """Largest multiple-of-128 divisor of M <= cap, preferring >=2 grid steps."""
    best = None
    for t in range(128, min(cap, M) + 1, 128):
        if M % t == 0:
            if M // t >= 2:
                best = t
            elif best is None:
                best = t
    return best if best is not None else M


def conv_lstm_cell(x, state, weight, bias, *, feature_size, num_features,
                   forget_bias=1.0):
    """ConvLstmCell.forward.

    x      : (N, num_features,   H, W)   NCHW (PyTorch convention)
    state  : (N, 2*num_features, H, W)   concat(c, h) along channels
    weight : (4*num_features, 2*num_features, K, K)  PyTorch OIHW conv weight
    bias   : (4*num_features,)
    returns (new_h, new_state) with new_state = concat(new_c, new_h) on dim 1.
    """
    N, C, H, W = x.shape
    assert C == num_features
    K = feature_size
    p = (K - 1) // 2          # matches the module's padding=(K-1)/2 (odd K)
    Cin = 2 * num_features
    Cout = 4 * num_features
    M = N * H * W

    # ---- glue: split state, concat(input, h), im2col, flatten to (.., M) ----
    c_state, h_state = jnp.split(state, 2, axis=1)              # (N, C, H, W)
    conv_in = jnp.concatenate([x, h_state], axis=1)             # (N, Cin, H, W)
    inp = jnp.pad(conv_in, ((0, 0), (0, 0), (p, p), (p, p)))    # (N, Cin, Hp, Wp)
    taps = [inp[:, :, kh:kh + H, kw:kw + W]
            for kh in range(K) for kw in range(K)]              # (N, Cin, H, W) each
    patches = jnp.stack(taps, axis=0)                           # (K*K, N, Cin, H, W)
    patches = patches.transpose(2, 0, 1, 3, 4)                  # (Cin, K*K, N, H, W)
    patches = patches.reshape(Cin * K * K, M).astype(jnp.bfloat16)

    # Weight: OIHW -> (Cout, Cin*K*K); same k-ordering as patches.
    w2 = weight.reshape(Cout, Cin * K * K).astype(jnp.bfloat16)

    # Bias with forget_bias folded into the f-gate rows (rows 2C:3C).
    fb = jnp.zeros((Cout,), jnp.float32).at[
        2 * num_features:3 * num_features].set(jnp.float32(forget_bias))
    b2 = (bias.astype(jnp.float32) + fb).reshape(Cout, 1)

    # Previous cell state, lane-dense: (C, N*H*W).
    c_flat = c_state.astype(jnp.float32).transpose(1, 0, 2, 3).reshape(
        num_features, M)

    tm = _pick_m_tile(M)
    grid = (M // tm,)
    KKCin = Cin * K * K

    kernel = functools.partial(_convlstm_gate_kernel, C=num_features)

    new_h_flat, new_c_flat = pl.pallas_call(
        kernel,
        grid=grid,
        in_specs=[
            pl.BlockSpec((KKCin, tm), lambda i: (0, i)),          # patches
            pl.BlockSpec((Cout, KKCin), lambda i: (0, 0)),        # weight
            pl.BlockSpec((Cout, 1), lambda i: (0, 0)),            # bias
            pl.BlockSpec((num_features, tm), lambda i: (0, i)),   # c_prev
        ],
        out_specs=[
            pl.BlockSpec((num_features, tm), lambda i: (0, i)),   # new_h
            pl.BlockSpec((num_features, tm), lambda i: (0, i)),   # new_c
        ],
        out_shape=[
            jax.ShapeDtypeStruct((num_features, M), jnp.float32),
            jax.ShapeDtypeStruct((num_features, M), jnp.float32),
        ],
        compiler_params=pltpu.CompilerParams(
            dimension_semantics=("parallel",),
            vmem_limit_bytes=32 * 1024 * 1024),
    )(patches, w2, b2, c_flat)

    # ---- glue: (C, N*H*W) -> NCHW, rebuild state ----
    new_h = new_h_flat.reshape(num_features, N, H, W).transpose(1, 0, 2, 3)
    new_c = new_c_flat.reshape(num_features, N, H, W).transpose(1, 0, 2, 3)
    new_state = jnp.concatenate([new_c, new_h], axis=1)
    return new_h.astype(x.dtype), new_state.astype(state.dtype)


def _reference_forward(x, state, weight, bias, *, feature_size, forget_bias):
    """Pure-JAX reference mirroring the PyTorch module (NCHW, f32)."""
    K = feature_size
    p = (K - 1) // 2
    c, h = jnp.split(state, 2, axis=1)
    conv_in = jnp.concatenate([x, h], axis=1)
    out = jax.lax.conv_general_dilated(
        conv_in, weight, window_strides=(1, 1), padding=[(p, p), (p, p)],
        dimension_numbers=("NCHW", "OIHW", "NCHW"))
    out = out + bias[None, :, None, None]
    i, j, f, o = jnp.split(out, 4, axis=1)
    new_c = c * jax.nn.sigmoid(f + forget_bias) + jax.nn.sigmoid(i) * jnp.tanh(j)
    new_h = jnp.tanh(new_c) * jax.nn.sigmoid(o)
    new_state = jnp.concatenate([new_c, new_h], axis=1)
    return new_h, new_state


if __name__ == "__main__":
    # Small shapes consistent with the module:
    #   feature_size (conv kernel) = 3, num_features = 4, batch = 2, spatial = 16
    batch, num_features, feature_size, spatial = 2, 4, 3, 16
    forget_bias = 1.0

    key = jax.random.PRNGKey(0)
    kx, ks, kw, kb = jax.random.split(key, 4)

    x = jax.random.normal(kx, (batch, num_features, spatial, spatial),
                          dtype=jnp.float32)
    state = jax.random.normal(ks, (batch, 2 * num_features, spatial, spatial),
                              dtype=jnp.float32)

    # Deterministic synthetic conv parameters (Conv2d(2C -> 4C, K, pad=(K-1)//2)).
    fan_in = 2 * num_features * feature_size * feature_size
    bound = 1.0 / np.sqrt(fan_in)
    weight = jax.random.uniform(
        kw, (4 * num_features, 2 * num_features, feature_size, feature_size),
        minval=-bound, maxval=bound, dtype=jnp.float32)
    bias = jax.random.uniform(kb, (4 * num_features,),
                              minval=-bound, maxval=bound, dtype=jnp.float32)

    new_h, new_state = conv_lstm_cell(
        x, state, weight, bias,
        feature_size=feature_size, num_features=num_features,
        forget_bias=forget_bias)
    jax.block_until_ready((new_h, new_state))

    ref_h, ref_state = _reference_forward(
        x, state, weight, bias,
        feature_size=feature_size, forget_bias=forget_bias)

    # bf16 matmul operands (f32 accumulation) -> loosened tolerance vs f32 ref.
    np.testing.assert_allclose(np.asarray(new_h), np.asarray(ref_h),
                               rtol=3e-2, atol=3e-2)
    np.testing.assert_allclose(np.asarray(new_state), np.asarray(ref_state),
                               rtol=3e-2, atol=3e-2)

    print("KERNEL_OK")
</pallas_src>

<mosaic_0001>
module attributes {stable_mosaic.version = 11 : i64} {
  func.func @_convlstm_gate_kernel(%arg0: i32, %arg1: memref<72x256xbf16, #tpu.memory_space<vmem>>, %arg2: memref<16x72xbf16, #tpu.memory_space<vmem>>, %arg3: memref<16x1xf32, #tpu.memory_space<vmem>>, %arg4: memref<4x256xf32, #tpu.memory_space<vmem>>, %arg5: memref<4x256xf32, #tpu.memory_space<vmem>>, %arg6: memref<4x256xf32, #tpu.memory_space<vmem>>) attributes {dimension_semantics = [#tpu.dimension_semantics<parallel>], iteration_bounds = array<i64: 2>, scalar_prefetch = 0 : i64, scratch_operands = 0 : i64, tpu.core_type = #tpu.core_type<tc>, window_params = [{transform_indices = @transform_0, window_bounds = array<i64: 72, 256>}, {pipeline_mode = #tpu.pipeline_mode<synchronous>, transform_indices = @transform_1, window_bounds = array<i64: 16, 72>}, {pipeline_mode = #tpu.pipeline_mode<synchronous>, transform_indices = @transform_2, window_bounds = array<i64: 16, 1>}, {transform_indices = @transform_3, window_bounds = array<i64: 4, 256>}, {transform_indices = @transform_4, window_bounds = array<i64: 4, 256>}, {transform_indices = @transform_5, window_bounds = array<i64: 4, 256>}]} {
    %c0 = arith.constant 0 : index
    %c0_0 = arith.constant 0 : index
    %0 = vector.load %arg2[%c0, %c0_0] : memref<16x72xbf16, #tpu.memory_space<vmem>>, vector<16x72xbf16>
    %c0_1 = arith.constant 0 : index
    %c0_2 = arith.constant 0 : index
    %1 = vector.load %arg1[%c0_1, %c0_2] : memref<72x256xbf16, #tpu.memory_space<vmem>>, vector<72x256xbf16>
    %cst = arith.constant dense<0.000000e+00> : vector<16x256xf32>
    %2 = tpu.matmul %0, %1, %cst {dimension_numbers = #tpu.dot_dimension_numbers<[1], [0], [0], [1], [0, 0, 1, 1], [], []>} : vector<16x72xbf16>, vector<72x256xbf16>, vector<16x256xf32> -> vector<16x256xf32>
    %c0_3 = arith.constant 0 : index
    %c0_4 = arith.constant 0 : index
    %3 = vector.load %arg3[%c0_3, %c0_4] : memref<16x1xf32, #tpu.memory_space<vmem>>, vector<16x1xf32>
    %4 = vector.broadcast %3 : vector<16x1xf32> to vector<16x256xf32>
    %5 = arith.addf %2, %4 : vector<16x256xf32>
    %6 = arith.negf %5 : vector<16x256xf32>
    %7 = math.exp %6 : vector<16x256xf32>
    %cst_5 = arith.constant 1.000000e+00 : f32
    %8 = vector.broadcast %cst_5 : f32 to vector<16x256xf32>
    %9 = arith.addf %8, %7 : vector<16x256xf32>
    %10 = arith.divf %8, %9 : vector<16x256xf32>
    %11 = vector.extract_strided_slice %10 {offsets = [0, 0], sizes = [4, 256], strides = [1, 1]} : vector<16x256xf32> to vector<4x256xf32>
    %12 = vector.extract_strided_slice %10 {offsets = [8, 0], sizes = [4, 256], strides = [1, 1]} : vector<16x256xf32> to vector<4x256xf32>
    %13 = vector.extract_strided_slice %10 {offsets = [12, 0], sizes = [4, 256], strides = [1, 1]} : vector<16x256xf32> to vector<4x256xf32>
    %14 = vector.extract_strided_slice %5 {offsets = [4, 0], sizes = [4, 256], strides = [1, 1]} : vector<16x256xf32> to vector<4x256xf32>
    %15 = math.tanh %14 : vector<4x256xf32>
    %c0_6 = arith.constant 0 : index
    %c0_7 = arith.constant 0 : index
    %16 = vector.load %arg4[%c0_6, %c0_7] : memref<4x256xf32, #tpu.memory_space<vmem>>, vector<4x256xf32>
    %17 = arith.mulf %16, %12 : vector<4x256xf32>
    %18 = arith.mulf %11, %15 : vector<4x256xf32>
    %19 = arith.addf %17, %18 : vector<4x256xf32>
    %20 = math.tanh %19 : vector<4x256xf32>
    %21 = arith.mulf %20, %13 : vector<4x256xf32>
    %c0_8 = arith.constant 0 : index
    %c0_9 = arith.constant 0 : index
    %22 = vector.load %arg6[%c0_8, %c0_9] : memref<4x256xf32, #tpu.memory_space<vmem>>, vector<4x256xf32>
    tpu.vector_store %arg6[%c0_8, %c0_9], %19 {strides = array<i32>} : memref<4x256xf32, #tpu.memory_space<vmem>>, vector<4x256xf32>,
    %c0_10 = arith.constant 0 : index
    %c0_11 = arith.constant 0 : index
    %23 = vector.load %arg5[%c0_10, %c0_11] : memref<4x256xf32, #tpu.memory_space<vmem>>, vector<4x256xf32>
    tpu.vector_store %arg5[%c0_10, %c0_11], %21 {strides = array<i32>} : memref<4x256xf32, #tpu.memory_space<vmem>>, vector<4x256xf32>,
    return
  }
  func.func @transform_0(%arg0: i32) -> (i32, i32) {
    %c0_i32 = arith.constant 0 : i32
    %c0_i32_0 = arith.constant 0 : i32
    return %c0_i32, %arg0 : i32, i32
  }
  func.func @transform_1(%arg0: i32) -> (i32, i32) {
    %c0_i32 = arith.constant 0 : i32
    %c0_i32_0 = arith.constant 0 : i32
    %c0_i32_1 = arith.constant 0 : i32
    return %c0_i32, %c0_i32_0 : i32, i32
  }
  func.func @transform_2(%arg0: i32) -> (i32, i32) {
    %c0_i32 = arith.constant 0 : i32
    %c0_i32_0 = arith.constant 0 : i32
    %c0_i32_1 = arith.constant 0 : i32
    return %c0_i32, %c0_i32_0 : i32, i32
  }
  func.func @transform_3(%arg0: i32) -> (i32, i32) {
    %c0_i32 = arith.constant 0 : i32
    %c0_i32_0 = arith.constant 0 : i32
    return %c0_i32, %arg0 : i32, i32
  }
  func.func @transform_4(%arg0: i32) -> (i32, i32) {
    %c0_i32 = arith.constant 0 : i32
    %c0_i32_0 = arith.constant 0 : i32
    return %c0_i32, %arg0 : i32, i32
  }
  func.func @transform_5(%arg0: i32) -> (i32, i32) {
    %c0_i32 = arith.constant 0 : i32
    %c0_i32_0 = arith.constant 0 : i32
    return %c0_i32, %arg0 : i32, i32
  }
}

</mosaic_0001>

<bundles_post_ra>
// kernel: tpu_custom_call.1
= control target key start
LH: loop header
LB: loop body
LE: loop exit
PB: predicated region body
PF: predicated region fallthrough
CT: control target
= control target key end

     0   :  { %s1287_s0 = inlined_call_operand.hbm [shape: bf16[72,512], index: 0, kind: input, shape index: {}]   ;;  %s1288_s1 = inlined_call_operand.hbm [shape: bf16[16,72], index: 1, kind: input, shape index: {}]   ;;  %s1289_s2 = inlined_call_operand.vmem [shape: f32[16,1], index: 2, kind: input, shape index: {}]   ;;  %s1290_s3 = inlined_call_operand.vmem [shape: f32[4,512], index: 3, kind: input, shape index: {}]   ;;  %s1291_s4 = inlined_call_operand.hbm [shape: f32[4,512], index: 4, kind: output, shape index: {0}]   ;;  %s1292_s5 = inlined_call_operand.hbm [shape: f32[4,512], index: 5, kind: output, shape index: {1}]  }
   0x1   :  { %1293 = sst [smem:[#allocation14_spill]] %s1288_s1 }
   0x2   :  { %11 = vsyncpa [#allocation3], 0 }
   0x3   :  { %13 = vsyncpa [#allocation3 + $0x1], 0 }
   0x4   :  { %14 = vsyncpa [#allocation6], 0 }
   0x5   :  { %15 = vsyncpa [#allocation4], 0 }
   0x6   :  { %17 = vsyncpa [#allocation4 + $0x1], 0 }
   0x7   :  { %18 = vsyncpa [#allocation9], 0 }
   0x8   :  { %20 = vsyncpa [#allocation9 + $0x1], 0  ;;  %s1049_s18 = smov 0   ;;  %s1051_s19 = smov 0  }
   0x9   :  { %s1053_s20 = smov 0   ;;  %s1055_s21 = smov 0  }
   0xa LB: > { %s1070_s22 = sadd.s32 4294967295, %s1010_s21   ;;  %s681_s23 = sadd.s32 4294967294, %s1010_s21   ;;  %s1010_s21 = sphi %s1055_s21, %s1309_s21   ;;  %s1006_s20 = sphi %s1053_s20, %s1308_s20   ;;  %s1002_s19 = sphi %s1051_s19, %s1307_s19   ;;  %s998_s18 = sphi %s1049_s18, %s1306_s18  }
   0xb   : > { %p46_p0 = scmp.ne.s32.totalorder %s1002_s19, %s998_s18  ;;  %p47_p1 = scmp.eq.s32.totalorder %s1070_s22, 0 }
   0xc   : > { %p138_p2 = scmp.eq.s32.totalorder %s1070_s22, 1  ;;  %p144_p3 = scmp.eq.s32.totalorder %s681_s23, 1 }
   0xd   : > { %p1079_p4 = por %p47_p1, %p46_p0  ;;  %p682_p5 = scmp.ge.s32.totalorder %s1010_s21, 1 }
   0xe   : > { %p1084_p6 = por %p144_p3, %p46_p0  ;;  %p177_p7 = scmp.lt.s32.totalorder %s1010_s21, 3 }
   0xf   : > { %s1296_s1 = sld [smem:[#allocation14_spill]]  ;;  %s1012_s30 = smov [#allocation5]  }
  0x10   : > { %p1092_p8 = pnand %p682_p5, %p177_p7  ;;  %s190_s6 = sshll.u32 %s1012_s30, 4  ;;  %s191_s6 = int_to_ptr.vmem [resolvable:$true] %s190_s6 }
  0x11   : > { %s1102_s7 = sadd.s32 1, %s1010_s21   ;;  %s1013_s8 = smov 64  }
  0x12   : > { %p767_p9 = pneg %p1092_p8  ;;  %s1014_s9 = smov 4  }
  0x13   : > { %s30_s10 = ssub.s32 %s1010_s21, %s1102_s7  ;;  %s33_s11 = sadd.s32 1, %s1006_s20 }
  0x14   : > { %p768_p10 = pnand %p767_p9, %p47_p1  ;;  %p31_p12 = scmp.eq.s32.totalorder %s30_s10, 0 }
  0x15   : > { %s188_s28 = sshll.u32 %s1296_s1, 4  ;;  %p40_p13 = scmp.ne.s32.totalorder %s1006_s20, %s1002_s19  ;;  %s189_s28 = int_to_ptr.hbm [resolvable:$true] %s188_s28 }
  0x16   : > { %770 = dma.hbm_to_vmem [thread:$0]  (!%p768_p10), %s189_s28, 128, %s191_s6, [#allocation6], %s1013_s8, %s1013_s8, %s1014_s9  }
  0x17   : > { %p41_p0 = scmp.eq.s32.totalorder %s1010_s21, 0  ;;  %p783_p3 = scmp.lt.s32.totalorder %s1010_s21, 2 }
  0x18   : > { %s1112_s12 = scalar_select %p31_p12, %s1006_s20, %s33_s11  }
  0x19   : > { %p42_p5 = por %p41_p0, %p40_p13  ;;  %p1116_p7 = por %p138_p2, %p40_p13 }
  0x1a   : > { %s207_s14 = sand.u32 1, %s1006_s20   ;;  %s743_s15 = sshll.u32 %s1010_s21, 3 }
  0x1b   : > { %s755_s16 = smul.u32 72, %s207_s14  ;;  %s216_s26 = scalar_lea.hbm %s1287_s0, %s743_s15 }
  0x1c   : > { %p1125_p9 = pnand %p783_p3, %p42_p5  ;;  %s217_s28 = sshll.u32 %s216_s26, 4  ;;  %s218_s28 = int_to_ptr.hbm [resolvable:$true] %s217_s28 }
  0x1d   : > { %s211_s30 = scalar_lea.vmem [#allocation2], %s755_s16  ;;  %s208_s8 = scalar_lea.sflag [#allocation3], %s207_s14 }
  0x1e   : > { %s219_s6 = sshll.u32 %s211_s30, 4  ;;  %s878_s9 = sshra.s32 %s218_s28, 4  ;;  %s220_s6 = int_to_ptr.vmem [resolvable:$true] %s219_s6  ;;  %s879_s9 = int_to_ptr.hbm [resolvable:$true] %s878_s9 }
  0x1f   : > { %s880_s10 = scalar_lea.hbm %s879_s9, 72  ;;  %p882_p10 = pneg %p1125_p9 }
  0x20   : > { %p881_p2 = scmp.ne.s32.totalorder %s879_s9, %s880_s10  ;;  %s885_s17 = scalar_lea.hbm %s1287_s0, 144 }
  0x21   : > { %p886_p0 = scmp.lt.s32.totalorder %s879_s9, %s1287_s0  ;;  %p887_p3 = scmp.lt.s32.totalorder %s885_s17, %s880_s10 }
  0x22   : > { %p883_p12 = pnand %p882_p10, %p881_p2 }
  0x23   : > { %p888_p5 = por %p887_p3, %p886_p0 }
  0x24   : > { %p884_p13 = pneg %p883_p12 }
  0x26   : > { %p889_p11 = pnand %p888_p5, %p884_p13 }
  0x28   : > { %892 = shalt.err (!%p889_p11)
}
  0x29   : > { %s1015_s14 = smov 256   ;;  %s1016_s16 = smov 128  }
  0x2a   : > { %s1017_s26 = smov 8   ;;  %240 = sbr.rel (%p1092_p8) target bundleno = 267 (0x10b), region = 36 }
  0x2b   : > { %774 = dma.hbm_to_vmem [thread:$0]  (!%p1125_p9), %s218_s28, 1152, %s220_s6, %s208_s8, %s1015_s14, %s1016_s16, %s1017_s26  }
  0x2c   : > { %s1142_s30 = sand.u32 (!%p1092_p8), 1, %s1002_s19  }
  0x2d   : > { %s756_s1 = smul.u32 (!%p1092_p8), 72, %s1142_s30  ;;  %s243_s9 = scalar_lea.sflag (!%p1092_p8), [#allocation3], %s1142_s30 }
  0x2f   : > { %s1146_s10 = scalar_lea.vmem [#allocation2], %s756_s1 }
  0x30   : > { %981 = dma.done.wait (%p1079_p4), %s243_s9, 1152  }
  0x31   : > { %983 = vsyncadd (%p1079_p4), %s243_s9, 4294966144 }
  0x32   : > { %985 = dma.done.wait (%p47_p1), [#allocation6], 128  }
  0x33   : > { %987 = vsyncadd (%p47_p1), [#allocation6], 4294967168  ;;  %v1018_v0 = vmov 0   ;;  %v309_v1 = vld [vmem:[%s1146_s10 + $0x40] sm:$0xff]  ;;  %vm376_vm0 = vcmask 1043456   ;;  %v310_v15 = vld [vmem:[%s1289_s2] sm:$0xff] }
  0x34   : > { %825 = vset.pattern.permute.xlu0 %v1018_v0  ;;  %v352_v2 = vunpack.c.l.b16 %v309_v1  ;;  %v353_v3 = vunpack.c.h.b16 %v309_v1  ;;  %v723_v4 = vld [vmem:[%s1146_s10 + $0x30] sm:$0xf]  ;;  %v752_v7 = vld [vmem:[%s1146_s10 + $0x34] sm:$0xf0]  ;;  %v751_v8 = vld [vmem:[%s1146_s10 + $0x34] sm:$0xf] }
  0x35   : > { %v725_v9 = vld [vmem:[%s1146_s10 + $0x38] sm:$0xf0]  ;;  %v724_v12 = vor.u32 %v752_v7, %v723_v4  ;;  %v715_v14 = vld [vmem:[%s1146_s10 + $0x20] sm:$0xf]  ;;  %v750_v16 = vld [vmem:[%s1146_s10 + $0x24] sm:$0xf0]  ;;  %314 = vperm.xlu0 %825, %v310_v15  }
  0x36   : > { %v362_v5 = vpack.c.b16 %v352_v2, %v352_v2  ;;  %v363_v6 = vpack.c.b16 %v353_v3, %v353_v3  ;;  %v728_v13 = vor.u32 %v751_v8, %v725_v9  ;;  %v749_v17 = vld [vmem:[%s1146_s10 + $0x24] sm:$0xf]  ;;  %v717_v18 = vld [vmem:[%s1146_s10 + $0x28] sm:$0xf0]  ;;  %v716_v19 = vor.u32 %v750_v16, %v715_v14  ;;  %v707_v21 = vld [vmem:[%s1146_s10 + $0x10] sm:$0xf] }
  0x37   : > { %v720_v20 = vor.u32 %v749_v17, %v717_v18  ;;  %v748_v22 = vld [vmem:[%s1146_s10 + $0x14] sm:$0xf0]  ;;  %v747_v23 = vld [vmem:[%s1146_s10 + $0x14] sm:$0xf]  ;;  %v709_v24 = vld [vmem:[%s1146_s10 + $0x18] sm:$0xf0] }
  0x38   : > { %v378_v10 = vsel %vm376_vm0, %v362_v5, 0  ;;  %v381_v11 = vsel %vm376_vm0, %v363_v6, 0  ;;  %v311_v25 = vld [vmem:[%s1289_s2 + $0x8] sm:$0xff]  ;;  %v708_v26 = vor.u32 %v748_v22, %v707_v21  ;;  %v712_v27 = vor.u32 %v747_v23, %v709_v24  ;;  %v746_v29 = vld [vmem:[%s1146_s10 + $0x4] sm:$0xf0]  ;;  %s691_s6 = sshll.u32 %s1070_s22, 1 }
  0x39   : > { %386 = vmatpush.bf16.msra.mxu0 %v378_v10  ;;  %400 = vmatpush.bf16.msra.mxu1 %v381_v11  ;;  %v699_v28 = vld [vmem:[%s1146_s10] sm:$0xf]  ;;  %v745_v30 = vld [vmem:[%s1146_s10 + $0x4] sm:$0xf]  ;;  %v701_v31 = vld [vmem:[%s1146_s10 + $0x8] sm:$0xf0] }
  0x3a   : > { %v700_v32 = vor.u32 %v746_v29, %v699_v28  ;;  %v704_v33 = vor.u32 %v745_v30, %v701_v31  ;;  %v744_v34 = vld [vmem:[#allocation5] sm:$0xff]  ;;  %vm372_vm1 = vcmask 588800   ;;  %p1192_p1 = scmp.lt.s32.totalorder %s691_s6, 3  ;;  %s753_s15 = sshll.u32 %s1070_s22, 3 }
  0x3b   : > { %s689_s16 = sshll.u32 %s1142_s30, 3  ;;  %s551_s9 = scalar_lea.hbm %s1292_s5, %s753_s15 }
  0x3c   : > { %s1311_s6 = smov (!%p1192_p1, %s691_s6), 3  ;;  %s288_s10 = scalar_lea.vmem [#allocation8], %s689_s16 }
  0x3d   : > { %387 = vmatpush.bf16.msra.mxu0 %v724_v12  ;;  %401 = vmatpush.bf16.msra.mxu1 %v728_v13  ;;  %s692_s11 = sshll.u32 %s1311_s6, 2  ;;  %s553_s24 = sshll.u32 %s288_s10, 4  ;;  %s554_s24 = int_to_ptr.vmem [resolvable:$true] %s553_s24 }
  0x3e   : > { %319 = vperm.xlu0 %825, %v311_v25   ;;  %s294_s14 = scalar_lea.vmem %s1290_s3, %s692_s11  ;;  %s555_s29 = sshll.u32 %s551_s9, 4  ;;  %s556_s29 = int_to_ptr.hbm [resolvable:$true] %s555_s29 }
  0x3f   : > { %s536_s6 = scalar_lea.hbm %s1291_s4, %s753_s15  ;;  %s525_s8 = scalar_lea.sflag [#allocation9], %s1142_s30 }
  0x40   : > { %s922_s11 = sshra.s32 %s556_s29, 4  ;;  %s928_s26 = scalar_lea.hbm %s1292_s5, 16  ;;  %s923_s11 = int_to_ptr.hbm [resolvable:$true] %s922_s11 }
  0x41   : > { %388 = vmatpush.bf16.msra.mxu0 %v716_v19  ;;  %402 = vmatpush.bf16.msra.mxu1 %v720_v20  ;;  %s924_s17 = scalar_lea.hbm %s923_s11, 8  ;;  %p929_p9 = scmp.lt.s32.totalorder %s923_s11, %s1292_s5 }
  0x42   : > { %p925_p4 = scmp.ne.s32.totalorder %s923_s11, %s924_s17  ;;  %p930_p2 = scmp.lt.s32.totalorder %s928_s26, %s924_s17 }
  0x44   : > { %p926_p8 = pnand %p925_p4, %p1116_p7  ;;  %p931_p10 = por %p930_p2, %p929_p9 }
  0x45   : > { %389 = vmatpush.bf16.msra.mxu0 %v708_v26  ;;  %403 = vmatpush.bf16.msra.mxu1 %v712_v27 }
  0x46   : > { %p927_p11 = pneg %p926_p8 }
  0x48   : > { %p932_p12 = pnand %p931_p10, %p927_p11 }
  0x49   : > { %390 = vmatpush.bf16.msra.mxu0 %v700_v32  ;;  %404 = vmatpush.bf16.msra.mxu1 %v704_v33 }
  0x4c   : > { %729 = vmatmul.msk.bf16.vlgmr.msra.gmra.mxu0 %vm372_vm1, %v744_v34  ;;  %730 = vmatmul.msk.bf16.vlgmr.msra.gmra.mxu1 %vm372_vm1, %v744_v34 }
  0xa7   : > { %v315_v35 = vpop.permute.xlu0 %314 }
  0xb0   : > { %v320_v42 = vpop.permute.xlu0 %319 }
  0xc9   : > { %v392_v36 = vpop.f32.mrf.mxu0  ;;  %v406_v37 = vpop.f32.mrf.mxu1 }
  0xca   : > { %v393_v38 = vadd.f32 %v392_v36, %v315_v35  ;;  %v407_v39 = vadd.f32 %v406_v37, %v315_v35 }
  0xcc   : > { %v731_v40 = vmul.f32 -1.442695, %v393_v38  ;;  %v732_v41 = vmul.f32 -1.442695, %v407_v39 }
  0xce   : > { %826 = vpow2.f32 %v731_v40 }
  0xcf   : > { %828 = vpow2.f32 %v732_v41 }
  0xd1   : > { %v394_v43 = vpop.f32.mrf.mxu0  ;;  %v408_v44 = vpop.f32.mrf.mxu1 }
  0xd2   : > { %v395_v45 = vadd.f32 %v394_v43, %v320_v42  ;;  %v409_v46 = vadd.f32 %v408_v44, %v320_v42  ;;  %v489_v42 = vld [vmem:[%s294_s14] sm:$0xff] }
  0xd4   : > { %v827_v47 = vpop.eup %826  ;;  %v733_v48 = vmul.f32 -1.442695, %v395_v45  ;;  %v734_v51 = vmul.f32 -1.442695, %v409_v46 }
  0xd5   : > { %v829_v49 = vpop.eup %828  ;;  %v1181_v50 = vadd.f32 1.0, %v827_v47 }
  0xd6   : > { %v424_v52 = vadd.f32 1.0, %v829_v49  ;;  %830 = vpow2.f32 %v733_v48 }
  0xd7   : > { %832 = vrcp.f32 %v1181_v50  ;;  %vm432_vm4 = vweird.f32 %v1181_v50  ;;  %v436_v8 = vand.u32 2147483647, %v1181_v50  ;;  %v438_v12 = vand.u32 2147483648, %v1181_v50 }
  0xd8   : > { %834 = vrcp.f32 %v424_v52  ;;  %v453_v3 = vand.u32 2147483648, %v424_v52  ;;  %vm447_vm3 = vweird.f32 %v424_v52  ;;  %v451_v6 = vand.u32 2147483647, %v424_v52 }
  0xd9   : > { %836 = vpow2.f32 %v734_v51  ;;  %v439_v34 = vor.u32 1.1754944e-38, %v438_v12  ;;  %vm437_vm1 = vcmp.eq.f32.partialorder %v436_v8, 8.507059e+37 }
  0xda   : > { %838 = vtanh.f32 %v407_v39  ;;  %v454_v16 = vor.u32 1.1754944e-38, %v453_v3  ;;  %vm452_vm8 = vcmp.eq.f32.partialorder %v451_v6, 8.507059e+37 }
  0xdc   : > { %v831_v53 = vpop.eup %830 }
  0xdd   : > { %v1184_v54 = vpop.eup %832  ;;  %v425_v55 = vadd.f32 1.0, %v831_v53 }
  0xde   : > { %v835_v56 = vpop.eup %834  ;;  %v428_v58 = vmul.f32 %v1184_v54, %v1181_v50  ;;  %vm433_vm7 = vweird.f32 %v1184_v54 }
  0xdf   : > { %v837_v57 = vpop.eup %836  ;;  %v443_v59 = vmul.f32 %v835_v56, %v424_v52  ;;  %840 = vrcp.f32 %v425_v55  ;;  %vm448_vm2 = vweird.f32 %v835_v56  ;;  %v468_v14 = vand.u32 2147483648, %v425_v55  ;;  %vm1218_vm12 = vmor %vm432_vm4, %vm433_vm7 }
  0xe0   : > { %v1188_v60 = vadd.f32 1.0, %v837_v57  ;;  %v429_v62 = vsub.f32 1.0, %v428_v58  ;;  %v839_v0 = vpop.eup %838  ;;  %vm1199_vm5 = vmor %vm447_vm3, %vm448_vm2  ;;  %v466_v18 = vand.u32 2147483647, %v425_v55  ;;  %vm462_vm9 = vweird.f32 %v425_v55 }
  0xe1   : > { %v444_v61 = vsub.f32 1.0, %v443_v59  ;;  %v499_v10 = vrot.slane %v839_v0, 4  ;;  %v469_v25 = vor.u32 1.1754944e-38, %v468_v14 }
  0xe2   : > { %842 = vrcp.f32 %v1188_v60  ;;  %v430_v5 = vmul.f32 %v1184_v54, %v429_v62  ;;  %v483_v23 = vand.u32 2147483648, %v1188_v60  ;;  %v481_v27 = vand.u32 2147483647, %v1188_v60 }
  0xe3   : > { %v445_v63 = vmul.f32 %v835_v56, %v444_v61  ;;  %844 = vtanh.f32 %v393_v38  ;;  %vm467_vm13 = vcmp.eq.f32.partialorder %v466_v18, 8.507059e+37  ;;  %vm477_vm14 = vweird.f32 %v1188_v60 }
  0xe4   : > { %v431_v19 = vadd.f32 %v1184_v54, %v430_v5  ;;  %v484_v35 = vor.u32 1.1754944e-38, %v483_v23  ;;  %vm482_vm2 = vcmp.eq.f32.partialorder %v481_v27, 8.507059e+37 }
  0xe5   : > { %v841_v1 = vpop.eup %840  ;;  %v446_v2 = vadd.f32 %v835_v56, %v445_v63 }
  0xe6   : > { %v458_v4 = vmul.f32 %v841_v1, %v425_v55  ;;  %vm463_vm6 = vweird.f32 %v841_v1  ;;  %v435_v30 = vsel %vm1218_vm12, %v1184_v54, %v431_v19 }
  0xe7   : > { %v450_v13 = vsel %vm1199_vm5, %v835_v56, %v446_v2  ;;  %vm464_vm10 = vmor %vm462_vm9, %vm463_vm6  ;;  %v440_v37 = vsel %vm437_vm1, %v439_v34, %v435_v30 }
  0xe8   : > { %v843_v7 = vpop.eup %842  ;;  %v459_v11 = vsub.f32 1.0, %v458_v4  ;;  %v455_v21 = vsel %vm452_vm8, %v454_v16, %v450_v13 }
  0xe9   : > { %v473_v15 = vmul.f32 %v843_v7, %v1188_v60  ;;  %v845_v24 = vpop.eup %844  ;;  %vm478_vm11 = vweird.f32 %v843_v7  ;;  %v503_v31 = vmul.f32 %v499_v10, %v455_v21 }
  0xea   : > { %v460_v17 = vmul.f32 %v841_v1, %v459_v11  ;;  %vm479_vm15 = vmor %vm477_vm14, %vm478_vm11  ;;  %v498_v38 = vrot.slane %v845_v24, 4 }
  0xeb   : > { %v474_v20 = vsub.f32 1.0, %v473_v15  ;;  %v506_v40 = vrot.slane %v503_v31, 4 }
  0xec   : > { %v461_v22 = vadd.f32 %v841_v1, %v460_v17  ;;  %v502_v43 = vmul.f32 %v498_v38, %v440_v37 }
  0xed   : > { %v475_v26 = vmul.f32 %v843_v7, %v474_v20 }
  0xee   : > { %v465_v29 = vsel %vm464_vm10, %v841_v1, %v461_v22  ;;  %v507_v46 = vsel %vm376_vm0, %v502_v43, %v506_v40 }
  0xef   : > { %v470_v32 = vsel %vm467_vm13, %v469_v25, %v465_v29  ;;  %v476_v33 = vadd.f32 %v843_v7, %v475_v26 }
  0xf0   : > { %511 = vst.sshfl [vmem:[#allocation1] sm:$0xff pattern:$0x75316420] %v470_v32 }
  0xf1   : > { %v480_v36 = vsel %vm479_vm15, %v843_v7, %v476_v33 }
  0xf2   : > { %v485_v39 = vsel %vm482_vm2, %v484_v35, %v480_v36 }
  0xf3   : > { %v492_v41 = vrot.slane %v485_v39, 4  ;;  %512 = vst.sshfl [vmem:[#allocation1 + $0x8] sm:$0xff pattern:$0x75316420] %v485_v39 }
  0xf5   : > { %v493_v44 = vsel %vm376_vm0, %v470_v32, %v492_v41 }
  0xf6   : > { %v495_v45 = vmul.f32 %v493_v44, %v489_v42 }
  0xf8   : > { %v509_v47 = vadd.f32 %v507_v46, %v495_v45 }
  0xfa   : > { %846 = vtanh.f32 %v509_v47  ;;  %517 = vst [vmem:[%s288_s10] sm:$0xff] %v509_v47 }
  0xfb   : > { %935 = shalt.err (!%p932_p12)
}
  0xfc   : > { %764 = dma.vmem_to_hbm [thread:$0]  (%p1116_p7), %s554_s24, 128, %s556_s29, %s525_s8   ;;  %v514_v49 = vld [vmem:[#allocation1 + $0x1] ss:$2 sm:$0xff] }
  0xfd   : > { %s281_s22 = scalar_lea.vmem [#allocation7], %s689_s16  ;;  %s540_s10 = sshll.u32 %s536_s6, 4  ;;  %s541_s10 = int_to_ptr.hbm [resolvable:$true] %s540_s10 }
  0xfe   : > { %s538_s15 = sshll.u32 %s281_s22, 4  ;;  %s520_s27 = scalar_lea.sflag [#allocation4], %s1142_s30  ;;  %s539_s15 = int_to_ptr.vmem [resolvable:$true] %s538_s15 }
  0xff   : > { %s950_s28 = sshra.s32 %s541_s10, 4  ;;  %s956_s16 = scalar_lea.hbm %s1291_s4, 16  ;;  %s951_s28 = int_to_ptr.hbm [resolvable:$true] %s950_s28 }
 0x100   : > { %v847_v48 = vpop.eup %846  ;;  %s952_s11 = scalar_lea.hbm %s951_s28, 8  ;;  %p957_p5 = scmp.lt.s32.totalorder %s951_s28, %s1291_s4 }
 0x101   : > { %v516_v50 = vmul.f32 %v847_v48, %v514_v49  ;;  %p953_p13 = scmp.ne.s32.totalorder %s951_s28, %s952_s11  ;;  %p958_p1 = scmp.lt.s32.totalorder %s956_s16, %s952_s11 }
 0x103   : > { %518 = vst [vmem:[%s281_s22] sm:$0xff] %v516_v50  ;;  %p954_p0 = pnand %p953_p13, %p1116_p7  ;;  %p959_p4 = por %p958_p1, %p957_p5 }
 0x105   : > { %p955_p3 = pneg %p954_p0 }
 0x107   : > { %p960_p8 = pnand %p959_p4, %p955_p3 }
 0x109   : > { %963 = shalt.err (!%p960_p8)
}
 0x10a   : > { %763 = dma.vmem_to_hbm [thread:$0]  (%p1116_p7), %s539_s15, 128, %s541_s10, %s520_s27  }
 0x10b PF: > { %s567_s30 = sand.u32 1, %s998_s18   ;;  %p1305_p11 = scmp.ge.s32.totalorder %s1010_s21, 2 }
 0x10c   : > { %s568_s8 = scalar_lea.sflag [#allocation4], %s567_s30 }
 0x10d   : > { %p776_p9 = pnand %p1305_p11, %p1084_p6 }
 0x10f   : > { %p777_p2 = pneg %p776_p9 }
 0x111   : > { %989 = dma.done.wait (%p777_p2), %s568_s8, 128  }
 0x112   : > { %991 = vsyncadd (%p777_p2), %s568_s8, 4294967168  ;;  %s578_s23 = scalar_lea.sflag [#allocation9], %s567_s30 }
 0x113   : > { %993 = dma.done.wait (%p777_p2), %s578_s23, 128  }
 0x114   : > { %995 = vsyncadd (%p777_p2), %s578_s23, 4294967168  ;;  %p23_p7 = scmp.ge.s32.totalorder %s1102_s7, 4   ;;  %s1306_s18 = smov %s1002_s19 }
 0x115   : > { %s1307_s19 = smov %s1006_s20  ;;  %s1308_s20 = smov %s1112_s12 }
 0x116   : > { %s1309_s21 = smov %s1102_s7  ;;  %25 = sbr.rel (!%p23_p7) target bundleno = 10 (0xa), region = 106 }
 0x11b   :  { %584 = vsyncpa [#allocation3], 1 }
 0x11c   :  { %586 = vsyncpa [#allocation3 + $0x1], 1 }
 0x11d   :  { %587 = vsyncpa [#allocation6], 1 }
 0x11e   :  { %588 = vsyncpa [#allocation4], 1 }
 0x11f   :  { %590 = vsyncpa [#allocation4 + $0x1], 1 }
 0x120   :  { %591 = vsyncpa [#allocation9], 1 }
 0x121   :  { %593 = vsyncpa [#allocation9 + $0x1], 1 }

</bundles_post_ra>
